<compile_context>
chip_gen: v7x
topology: tpu7x:2x2x1
jax: 0.10.0
libtpu: 0.0.40
codegen_flags: <defaults>
</compile_context>

<pallas_src>
import math

import jax
import jax.numpy as jnp
import numpy as np
from jax import lax
from jax.experimental import pallas as pl
from jax.experimental.pallas import tpu as pltpu


# --------------------------------------------------------------------------- kernel ----

def _make_conv3x3_kernel(c_in, c_out, H, W, TH, compute_dtype, single_tile):
    """Fused 3x3 'same' conv: 3-kh im2col slab + 3 per-kw MXU matmuls, lane-dense out."""
    Wp = W + 2

    def _shift_left(p, k):
        # out[:, j] = p[:, j + k], zero-filled tail.  The tail only lands in the 2 junk
        # columns of the tile's last row (trimmed in the wrapper), so correctness does
        # not depend on rotate wrap semantics.  Lowers to one lane shift (XLU slot).
        if k == 0:
            return p
        tail = jnp.zeros((p.shape[0], k), p.dtype)
        return jnp.concatenate([p[:, k:], tail], axis=1)

    def kernel(x_ref, w_ref, b_ref, o_ref, slab_ref):
        # x_ref   : (1, c_in, H*W)        full image (flat rows), one batch element
        # w_ref   : (3, c_out, 3*c_in)    per-kw fused weight slices
        # b_ref   : (c_out, 1)            f32 bias
        # o_ref   : (1, c_out, TH*Wp)     lane-dense conv output tile
        # slab_ref: VMEM (3*c_in, TH*Wp)  3-row-tap im2col slab

        zcol = jnp.zeros((c_in, 1), compute_dtype)             # hoisted out of the loop
        if single_tile:
            zrow = jnp.zeros((c_in, Wp), compute_dtype)
        else:
            row0 = pl.program_id(1) * TH - 1                   # global input row of padded row 0

        # Build the slab: every zero-bordered input row is written directly into the
        # (<= 3) slab row slots that need it -- no padded scratch, no value reshape,
        # border zeroing folded into the same stores.
        for r in range(TH + 2):                                # padded-tile row r
            if single_tile:
                g = r - 1                                      # static
                if 0 <= g < H:
                    row = x_ref[0, :, g * W:(g + 1) * W]
                    rowp = jnp.concatenate([zcol, row, zcol], axis=1)
                else:
                    rowp = zrow
            else:
                g = row0 + r
                valid = jnp.logical_and(g >= 0, g < H).astype(compute_dtype)
                gc = jnp.clip(g, 0, H - 1)
                start = gc * W
                if W % 128 == 0:
                    start = pl.multiple_of(start, 128)         # aligned row starts
                row = x_ref[0, :, pl.ds(start, W)] * valid     # halo / tail rows -> 0
                rowp = jnp.concatenate([zcol, row, zcol], axis=1)
            for kh in range(3):
                lr = r - kh                                    # local output row fed by this tap
                if 0 <= lr < TH:
                    slab_ref[kh * c_in:(kh + 1) * c_in, lr * Wp:(lr + 1) * Wp] = rowp

        # 3 per-kw matmuls (same total MXU work as one fused K=9*c_in matmul),
        # f32 accumulation; kw offsets handled by +/-1/2-lane shifts of the small partials.
        slab = slab_ref[...]
        p0 = jnp.dot(w_ref[0], slab, preferred_element_type=jnp.float32)
        p1 = jnp.dot(w_ref[1], slab, preferred_element_type=jnp.float32)
        p2 = jnp.dot(w_ref[2], slab, preferred_element_type=jnp.float32)
        acc = p0 + _shift_left(p1, 1) + _shift_left(p2, 2)
        acc = acc + b_ref[...]                                 # (c_out, 1) broadcast, f32
        o_ref[0] = acc.astype(o_ref.dtype)

    return kernel


# --------------------------------------------------------------------------- helpers ---

def _vmem_capacity_bytes():
    try:
        info = pltpu.get_tpu_info()
        for attr in ("vmem_capacity_bytes", "vmem_size_bytes", "vmem_bytes"):
            v = getattr(info, attr, None)
            if v:
                return int(v)
    except Exception:
        pass
    return 64 * 1024 * 1024        # conservative default (v7x per-TensorCore VMEM)


def _default_compute_dtype():
    """bf16 activations by default on v5e (1 vst slot + lowest HBM BW); f32 elsewhere."""
    try:
        kind = jax.devices()[0].device_kind.lower()
    except Exception:
        kind = ""
    if "v5e" in kind or "v5 lite" in kind or "v5lite" in kind:
        return jnp.bfloat16
    return jnp.float32


def _tile_padded_bytes(shape, dtype):
    """Rough (sublane, 128)-padded VMEM footprint of one buffer."""
    itemsize = jnp.dtype(dtype).itemsize
    s = list(shape)
    if len(s) == 1:
        s = [1] + s
    s[-1] = -(-s[-1] // 128) * 128
    sub = max(8, 32 // itemsize)
    s[-2] = -(-s[-2] // sub) * sub
    n = 1
    for d in s:
        n *= d
    return n * itemsize


def _pick_tile_h(H, W, c_in, c_out, cbytes, obytes, vmem_cap):
    """Rows per grid step: largest TH keeping slab + double-buffered blocks inside a
    per-core VMEM budget, with TH*Wp a multiple of 128 whenever the image is tiled."""
    Wp = W + 2
    if H <= 64:
        return H                               # fixed per-step overhead dominates; one tile
    q = 128 // math.gcd(Wp, 128)               # TH quantum keeping flat out block aligned
    budget = min(int(0.40 * vmem_cap), 28 << 20)
    fixed = 2 * c_in * H * W * cbytes + (2 << 20)                 # dbl-buffered input + slack
    per_row = 3 * c_in * Wp * cbytes + 2 * c_out * Wp * obytes    # slab + dbl-buffered output
    avail = budget - fixed
    th = (avail // per_row) if avail > per_row * q else q
    th = max(q, (th // q) * q)
    th = min(th, 256, H)                        # cap static unroll of the row loop
    if th >= H:
        return H
    return int(th)


# --------------------------------------------------------------------------- wrapper ---

def conv3x3_same_pallas(x, weight, bias, *, compute_dtype=None, tile_h=None):
    """x: (N, C_in, H, W); weight: (C_out, C_in, 3, 3); bias: (C_out,) -> (N, C_out, H, W)."""
    N, c_in, H, W = x.shape
    c_out = weight.shape[0]
    Wp = W + 2

    if compute_dtype is None:
        compute_dtype = _default_compute_dtype()
    compute_dtype = jnp.dtype(compute_dtype)
    bf16 = compute_dtype == jnp.dtype(jnp.bfloat16)
    out_dtype = jnp.dtype(jnp.bfloat16) if bf16 else jnp.dtype(x.dtype)
    cbytes = compute_dtype.itemsize
    obytes = out_dtype.itemsize

    vmem_cap = _vmem_capacity_bytes()
    TH = int(tile_h) if tile_h is not None else _pick_tile_h(
        H, W, c_in, c_out, cbytes, obytes, vmem_cap)
    TH = max(1, min(TH, H))
    nH = -(-H // TH)
    Hpad = nH * TH

    # Per-kw fused weight slices: w3[kw, co, kh*c_in + ci] = weight[co, ci, kh, kw].
    w3 = jnp.transpose(weight, (3, 0, 2, 1)).reshape(3, c_out, 3 * c_in).astype(compute_dtype)
    b2 = bias.reshape(c_out, 1).astype(jnp.float32)
    xf = x.reshape(N, c_in, H * W).astype(compute_dtype)      # flat rows (contiguous reshape)

    kernel = _make_conv3x3_kernel(c_in, c_out, H, W, TH, compute_dtype,
                                  single_tile=(nH == 1))

    # Scoped-VMEM: double-buffered in/out blocks + invariant operands + slab scratch.
    est = (2 * _tile_padded_bytes((1, c_in, H * W), compute_dtype)
           + 2 * _tile_padded_bytes((1, c_out, TH * Wp), out_dtype)
           + 2 * _tile_padded_bytes((3, c_out, 3 * c_in), compute_dtype)
           + 2 * _tile_padded_bytes((c_out, 1), jnp.float32)
           + _tile_padded_bytes((3 * c_in, TH * Wp), compute_dtype))
    vmem_limit = int(min(max(int(est * 1.25), 32 * 1024 * 1024), int(0.9 * vmem_cap)))

    cost = pl.CostEstimate(
        flops=2 * 9 * c_in * c_out * H * W * N,
        transcendentals=0,
        bytes_accessed=int(N * c_in * H * W * cbytes + N * c_out * Hpad * Wp * obytes
                           + 9 * c_in * c_out * cbytes + c_out * 4),
    )

    y = pl.pallas_call(
        kernel,
        out_shape=jax.ShapeDtypeStruct((N, c_out, Hpad * Wp), out_dtype),
        grid_spec=pltpu.PrefetchScalarGridSpec(
            num_scalar_prefetch=0,
            grid=(N, nH),
            in_specs=[
                pl.BlockSpec((1, c_in, H * W), lambda n, t: (n, 0, 0)),
                pl.BlockSpec((3, c_out, 3 * c_in), lambda n, t: (0, 0, 0)),
                pl.BlockSpec((c_out, 1), lambda n, t: (0, 0)),
            ],
            out_specs=pl.BlockSpec((1, c_out, TH * Wp), lambda n, t: (n, 0, t)),
            scratch_shapes=[pltpu.VMEM((3 * c_in, TH * Wp), compute_dtype)],
        ),
        compiler_params=pltpu.CompilerParams(
            dimension_semantics=("parallel", "parallel"),
            vmem_limit_bytes=vmem_limit,
        ),
        cost_estimate=cost,
    )(xf, w3, b2)

    # Trim the 2 junk columns per row + the Hpad overhang; XLA fuses this with the
    # pixel-shuffle transpose (kept outside so the kernel's store stays lane-dense).
    y = y.reshape(N, c_out, Hpad, Wp)[:, :, :H, :W]
    return y


def pixel_shuffle(x, scale):
    """(N, C*scale^2, H, W) -> (N, C, H*scale, W*scale). One cheap XLA transpose."""
    N, c_r2, H, W = x.shape
    C = c_r2 // (scale * scale)
    x = x.reshape(N, C, scale, scale, H, W)
    x = x.transpose(0, 1, 4, 2, 5, 3)
    return x.reshape(N, C, H * scale, W * scale)


def upsample_one_step(x, weight, bias, scale, *, compute_dtype=None):
    """Forward pass of UpsampleOneStep: conv3x3 (same) -> PixelShuffle(scale)."""
    y = conv3x3_same_pallas(x, weight, bias, compute_dtype=compute_dtype)
    y = pixel_shuffle(y, scale)
    return y.astype(x.dtype)


# ----------------------------------------------------------------------- init / ref ----

def init_params(key, num_feat, num_out_ch, scale, dtype=jnp.float32):
    """Deterministic init mimicking nn.Conv2d default (kaiming-uniform, a=sqrt(5))."""
    c_out = scale * scale * num_out_ch
    kw, kb = jax.random.split(key)
    fan_in = num_feat * 3 * 3
    bound_w = math.sqrt(6.0 / ((1.0 + 5.0) * fan_in))
    weight = jax.random.uniform(kw, (c_out, num_feat, 3, 3), dtype,
                                minval=-bound_w, maxval=bound_w)
    bound_b = 1.0 / math.sqrt(fan_in)
    bias = jax.random.uniform(kb, (c_out,), dtype, minval=-bound_b, maxval=bound_b)
    return weight, bias


def reference_forward(x, weight, bias, scale):
    """Pure-JAX reference (lax conv + pixel shuffle)."""
    y = lax.conv_general_dilated(
        x, weight, window_strides=(1, 1), padding=((1, 1), (1, 1)),
        dimension_numbers=("NCHW", "OIHW", "NCHW"))
    y = y + bias.reshape(1, -1, 1, 1)
    return pixel_shuffle(y, scale)


if __name__ == "__main__":
    # Small shapes consistent with the module: scale=2, num_feat=4, num_out_ch=3.
    scale = 2
    num_feat = 4
    num_out_ch = 3
    N, H, W = 2, 16, 16

    key = jax.random.PRNGKey(0)
    kx, kp = jax.random.split(key)
    x = jax.random.normal(kx, (N, num_feat, H, W), jnp.float32)
    weight, bias = init_params(kp, num_feat, num_out_ch, scale)

    fwd = jax.jit(upsample_one_step, static_argnums=(3,),
                  static_argnames=("compute_dtype",))

    ref = reference_forward(x, weight, bias, scale)

    # f32 compute path: tight check.
    out_f32 = jax.block_until_ready(fwd(x, weight, bias, scale, compute_dtype=jnp.float32))
    np.testing.assert_allclose(np.asarray(out_f32), np.asarray(ref),
                               rtol=1e-5, atol=1e-5)
    assert out_f32.shape == (N, num_out_ch, H * scale, W * scale)
    assert out_f32.dtype == x.dtype

    # bf16 compute path (bandwidth-optimized): loose check.
    out_bf16 = jax.block_until_ready(
        fwd(x, weight, bias, scale, compute_dtype=jnp.bfloat16))
    np.testing.assert_allclose(np.asarray(out_bf16), np.asarray(ref),
                               rtol=5e-2, atol=5e-2)
    assert out_bf16.dtype == x.dtype

    # Default (chip-dependent) compute-dtype path just has to run.
    out_def = jax.block_until_ready(fwd(x, weight, bias, scale))
    assert out_def.shape == ref.shape

    print("KERNEL_OK")
</pallas_src>

<mosaic_0001>
module attributes {stable_mosaic.version = 11 : i64} {
  func.func @kernel(%arg0: i32, %arg1: i32, %arg2: memref<1x4x256xf32, #tpu.memory_space<vmem>>, %arg3: memref<3x12x12xf32, #tpu.memory_space<vmem>>, %arg4: memref<12x1xf32, #tpu.memory_space<vmem>>, %arg5: memref<1x12x288xf32, #tpu.memory_space<vmem>>, %arg6: memref<12x288xf32, #tpu.memory_space<vmem>>) attributes {dimension_semantics = [#tpu.dimension_semantics<parallel>, #tpu.dimension_semantics<parallel>], iteration_bounds = array<i64: 2, 1>, scalar_prefetch = 0 : i64, scratch_operands = 1 : i64, tpu.core_type = #tpu.core_type<tc>, window_params = [{transform_indices = @transform_0, window_bounds = array<i64: 1, 4, 256>}, {pipeline_mode = #tpu.pipeline_mode<synchronous>, transform_indices = @transform_1, window_bounds = array<i64: 3, 12, 12>}, {pipeline_mode = #tpu.pipeline_mode<synchronous>, transform_indices = @transform_2, window_bounds = array<i64: 12, 1>}, {transform_indices = @transform_3, window_bounds = array<i64: 1, 12, 288>}]} {
    %cst = arith.constant 0.000000e+00 : f32
    %0 = vector.broadcast %cst : f32 to vector<4x1xf32>
    %cst_0 = arith.constant 0.000000e+00 : f32
    %1 = vector.broadcast %cst_0 : f32 to vector<4x18xf32>
    %c0 = arith.constant 0 : index
    %c0_1 = arith.constant 0 : index
    %2 = vector.load %arg6[%c0, %c0_1] : memref<12x288xf32, #tpu.memory_space<vmem>>, vector<4x18xf32>
    tpu.vector_store %arg6[%c0, %c0_1], %1 {strides = array<i32>} : memref<12x288xf32, #tpu.memory_space<vmem>>, vector<4x18xf32>,
    %c0_2 = arith.constant 0 : index
    %c0_3 = arith.constant 0 : index
    %c0_4 = arith.constant 0 : index
    %3 = vector.load %arg2[%c0_2, %c0_3, %c0_4] : memref<1x4x256xf32, #tpu.memory_space<vmem>>, vector<1x4x16xf32>
    %4 = vector.shape_cast %3 : vector<1x4x16xf32> to vector<4x16xf32>
    %5 = tpu.concatenate %0, %4, %0 in 1 : vector<4x1xf32>, vector<4x16xf32>, vector<4x1xf32> -> vector<4x18xf32>
    %c0_5 = arith.constant 0 : index
    %c18 = arith.constant 18 : index
    %6 = vector.load %arg6[%c0_5, %c18] : memref<12x288xf32, #tpu.memory_space<vmem>>, vector<4x18xf32>
    tpu.vector_store %arg6[%c0_5, %c18], %5 {strides = array<i32>} : memref<12x288xf32, #tpu.memory_space<vmem>>, vector<4x18xf32>,
    %c4 = arith.constant 4 : index
    %c0_6 = arith.constant 0 : index
    %7 = vector.load %arg6[%c4, %c0_6] : memref<12x288xf32, #tpu.memory_space<vmem>>, vector<4x18xf32>
    tpu.vector_store %arg6[%c4, %c0_6], %5 {strides = array<i32>} : memref<12x288xf32, #tpu.memory_space<vmem>>, vector<4x18xf32>,
    %c0_7 = arith.constant 0 : index
    %c0_8 = arith.constant 0 : index
    %c16 = arith.constant 16 : index
    %8 = vector.load %arg2[%c0_7, %c0_8, %c16] : memref<1x4x256xf32, #tpu.memory_space<vmem>>, vector<1x4x16xf32>
    %9 = vector.shape_cast %8 : vector<1x4x16xf32> to vector<4x16xf32>
    %10 = tpu.concatenate %0, %9, %0 in 1 : vector<4x1xf32>, vector<4x16xf32>, vector<4x1xf32> -> vector<4x18xf32>
    %c0_9 = arith.constant 0 : index
    %c36 = arith.constant 36 : index
    %11 = vector.load %arg6[%c0_9, %c36] : memref<12x288xf32, #tpu.memory_space<vmem>>, vector<4x18xf32>
    tpu.vector_store %arg6[%c0_9, %c36], %10 {strides = array<i32>} : memref<12x288xf32, #tpu.memory_space<vmem>>, vector<4x18xf32>,
    %c4_10 = arith.constant 4 : index
    %c18_11 = arith.constant 18 : index
    %12 = vector.load %arg6[%c4_10, %c18_11] : memref<12x288xf32, #tpu.memory_space<vmem>>, vector<4x18xf32>
    tpu.vector_store %arg6[%c4_10, %c18_11], %10 {strides = array<i32>} : memref<12x288xf32, #tpu.memory_space<vmem>>, vector<4x18xf32>,
    %c8 = arith.constant 8 : index
    %c0_12 = arith.constant 0 : index
    %13 = vector.load %arg6[%c8, %c0_12] : memref<12x288xf32, #tpu.memory_space<vmem>>, vector<4x18xf32>
    tpu.vector_store %arg6[%c8, %c0_12], %10 {strides = array<i32>} : memref<12x288xf32, #tpu.memory_space<vmem>>, vector<4x18xf32>,
    %c0_13 = arith.constant 0 : index
    %c0_14 = arith.constant 0 : index
    %c32 = arith.constant 32 : index
    %14 = vector.load %arg2[%c0_13, %c0_14, %c32] : memref<1x4x256xf32, #tpu.memory_space<vmem>>, vector<1x4x16xf32>
    %15 = vector.shape_cast %14 : vector<1x4x16xf32> to vector<4x16xf32>
    %16 = tpu.concatenate %0, %15, %0 in 1 : vector<4x1xf32>, vector<4x16xf32>, vector<4x1xf32> -> vector<4x18xf32>
    %c0_15 = arith.constant 0 : index
    %c54 = arith.constant 54 : index
    %17 = vector.load %arg6[%c0_15, %c54] : memref<12x288xf32, #tpu.memory_space<vmem>>, vector<4x18xf32>
    tpu.vector_store %arg6[%c0_15, %c54], %16 {strides = array<i32>} : memref<12x288xf32, #tpu.memory_space<vmem>>, vector<4x18xf32>,
    %c4_16 = arith.constant 4 : index
    %c36_17 = arith.constant 36 : index
    %18 = vector.load %arg6[%c4_16, %c36_17] : memref<12x288xf32, #tpu.memory_space<vmem>>, vector<4x18xf32>
    tpu.vector_store %arg6[%c4_16, %c36_17], %16 {strides = array<i32>} : memref<12x288xf32, #tpu.memory_space<vmem>>, vector<4x18xf32>,
    %c8_18 = arith.constant 8 : index
    %c18_19 = arith.constant 18 : index
    %19 = vector.load %arg6[%c8_18, %c18_19] : memref<12x288xf32, #tpu.memory_space<vmem>>, vector<4x18xf32>
    tpu.vector_store %arg6[%c8_18, %c18_19], %16 {strides = array<i32>} : memref<12x288xf32, #tpu.memory_space<vmem>>, vector<4x18xf32>,
    %c0_20 = arith.constant 0 : index
    %c0_21 = arith.constant 0 : index
    %c48 = arith.constant 48 : index
    %20 = vector.load %arg2[%c0_20, %c0_21, %c48] : memref<1x4x256xf32, #tpu.memory_space<vmem>>, vector<1x4x16xf32>
    %21 = vector.shape_cast %20 : vector<1x4x16xf32> to vector<4x16xf32>
    %22 = tpu.concatenate %0, %21, %0 in 1 : vector<4x1xf32>, vector<4x16xf32>, vector<4x1xf32> -> vector<4x18xf32>
    %c0_22 = arith.constant 0 : index
    %c72 = arith.constant 72 : index
    %23 = vector.load %arg6[%c0_22, %c72] : memref<12x288xf32, #tpu.memory_space<vmem>>, vector<4x18xf32>
    tpu.vector_store %arg6[%c0_22, %c72], %22 {strides = array<i32>} : memref<12x288xf32, #tpu.memory_space<vmem>>, vector<4x18xf32>,
    %c4_23 = arith.constant 4 : index
    %c54_24 = arith.constant 54 : index
    %24 = vector.load %arg6[%c4_23, %c54_24] : memref<12x288xf32, #tpu.memory_space<vmem>>, vector<4x18xf32>
    tpu.vector_store %arg6[%c4_23, %c54_24], %22 {strides = array<i32>} : memref<12x288xf32, #tpu.memory_space<vmem>>, vector<4x18xf32>,
    %c8_25 = arith.constant 8 : index
    %c36_26 = arith.constant 36 : index
    %25 = vector.load %arg6[%c8_25, %c36_26] : memref<12x288xf32, #tpu.memory_space<vmem>>, vector<4x18xf32>
    tpu.vector_store %arg6[%c8_25, %c36_26], %22 {strides = array<i32>} : memref<12x288xf32, #tpu.memory_space<vmem>>, vector<4x18xf32>,
    %c0_27 = arith.constant 0 : index
    %c0_28 = arith.constant 0 : index
    %c64 = arith.constant 64 : index
    %26 = vector.load %arg2[%c0_27, %c0_28, %c64] : memref<1x4x256xf32, #tpu.memory_space<vmem>>, vector<1x4x16xf32>
    %27 = vector.shape_cast %26 : vector<1x4x16xf32> to vector<4x16xf32>
    %28 = tpu.concatenate %0, %27, %0 in 1 : vector<4x1xf32>, vector<4x16xf32>, vector<4x1xf32> -> vector<4x18xf32>
    %c0_29 = arith.constant 0 : index
    %c90 = arith.constant 90 : index
    %29 = vector.load %arg6[%c0_29, %c90] : memref<12x288xf32, #tpu.memory_space<vmem>>, vector<4x18xf32>
    tpu.vector_store %arg6[%c0_29, %c90], %28 {strides = array<i32>} : memref<12x288xf32, #tpu.memory_space<vmem>>, vector<4x18xf32>,
    %c4_30 = arith.constant 4 : index
    %c72_31 = arith.constant 72 : index
    %30 = vector.load %arg6[%c4_30, %c72_31] : memref<12x288xf32, #tpu.memory_space<vmem>>, vector<4x18xf32>
    tpu.vector_store %arg6[%c4_30, %c72_31], %28 {strides = array<i32>} : memref<12x288xf32, #tpu.memory_space<vmem>>, vector<4x18xf32>,
    %c8_32 = arith.constant 8 : index
    %c54_33 = arith.constant 54 : index
    %31 = vector.load %arg6[%c8_32, %c54_33] : memref<12x288xf32, #tpu.memory_space<vmem>>, vector<4x18xf32>
    tpu.vector_store %arg6[%c8_32, %c54_33], %28 {strides = array<i32>} : memref<12x288xf32, #tpu.memory_space<vmem>>, vector<4x18xf32>,
    %c0_34 = arith.constant 0 : index
    %c0_35 = arith.constant 0 : index
    %c80 = arith.constant 80 : index
    %32 = vector.load %arg2[%c0_34, %c0_35, %c80] : memref<1x4x256xf32, #tpu.memory_space<vmem>>, vector<1x4x16xf32>
    %33 = vector.shape_cast %32 : vector<1x4x16xf32> to vector<4x16xf32>
    %34 = tpu.concatenate %0, %33, %0 in 1 : vector<4x1xf32>, vector<4x16xf32>, vector<4x1xf32> -> vector<4x18xf32>
    %c0_36 = arith.constant 0 : index
    %c108 = arith.constant 108 : index
    %35 = vector.load %arg6[%c0_36, %c108] : memref<12x288xf32, #tpu.memory_space<vmem>>, vector<4x18xf32>
    tpu.vector_store %arg6[%c0_36, %c108], %34 {strides = array<i32>} : memref<12x288xf32, #tpu.memory_space<vmem>>, vector<4x18xf32>,
    %c4_37 = arith.constant 4 : index
    %c90_38 = arith.constant 90 : index
    %36 = vector.load %arg6[%c4_37, %c90_38] : memref<12x288xf32, #tpu.memory_space<vmem>>, vector<4x18xf32>
    tpu.vector_store %arg6[%c4_37, %c90_38], %34 {strides = array<i32>} : memref<12x288xf32, #tpu.memory_space<vmem>>, vector<4x18xf32>,
    %c8_39 = arith.constant 8 : index
    %c72_40 = arith.constant 72 : index
    %37 = vector.load %arg6[%c8_39, %c72_40] : memref<12x288xf32, #tpu.memory_space<vmem>>, vector<4x18xf32>
    tpu.vector_store %arg6[%c8_39, %c72_40], %34 {strides = array<i32>} : memref<12x288xf32, #tpu.memory_space<vmem>>, vector<4x18xf32>,
    %c0_41 = arith.constant 0 : index
    %c0_42 = arith.constant 0 : index
    %c96 = arith.constant 96 : index
    %38 = vector.load %arg2[%c0_41, %c0_42, %c96] : memref<1x4x256xf32, #tpu.memory_space<vmem>>, vector<1x4x16xf32>
    %39 = vector.shape_cast %38 : vector<1x4x16xf32> to vector<4x16xf32>
    %40 = tpu.concatenate %0, %39, %0 in 1 : vector<4x1xf32>, vector<4x16xf32>, vector<4x1xf32> -> vector<4x18xf32>
    %c0_43 = arith.constant 0 : index
    %c126 = arith.constant 126 : index
    %41 = vector.load %arg6[%c0_43, %c126] : memref<12x288xf32, #tpu.memory_space<vmem>>, vector<4x18xf32>
    tpu.vector_store %arg6[%c0_43, %c126], %40 {strides = array<i32>} : memref<12x288xf32, #tpu.memory_space<vmem>>, vector<4x18xf32>,
    %c4_44 = arith.constant 4 : index
    %c108_45 = arith.constant 108 : index
    %42 = vector.load %arg6[%c4_44, %c108_45] : memref<12x288xf32, #tpu.memory_space<vmem>>, vector<4x18xf32>
    tpu.vector_store %arg6[%c4_44, %c108_45], %40 {strides = array<i32>} : memref<12x288xf32, #tpu.memory_space<vmem>>, vector<4x18xf32>,
    %c8_46 = arith.constant 8 : index
    %c90_47 = arith.constant 90 : index
    %43 = vector.load %arg6[%c8_46, %c90_47] : memref<12x288xf32, #tpu.memory_space<vmem>>, vector<4x18xf32>
    tpu.vector_store %arg6[%c8_46, %c90_47], %40 {strides = array<i32>} : memref<12x288xf32, #tpu.memory_space<vmem>>, vector<4x18xf32>,
    %c0_48 = arith.constant 0 : index
    %c0_49 = arith.constant 0 : index
    %c112 = arith.constant 112 : index
    %44 = vector.load %arg2[%c0_48, %c0_49, %c112] : memref<1x4x256xf32, #tpu.memory_space<vmem>>, vector<1x4x16xf32>
    %45 = vector.shape_cast %44 : vector<1x4x16xf32> to vector<4x16xf32>
    %46 = tpu.concatenate %0, %45, %0 in 1 : vector<4x1xf32>, vector<4x16xf32>, vector<4x1xf32> -> vector<4x18xf32>
    %c0_50 = arith.constant 0 : index
    %c144 = arith.constant 144 : index
    %47 = vector.load %arg6[%c0_50, %c144] : memref<12x288xf32, #tpu.memory_space<vmem>>, vector<4x18xf32>
    tpu.vector_store %arg6[%c0_50, %c144], %46 {strides = array<i32>} : memref<12x288xf32, #tpu.memory_space<vmem>>, vector<4x18xf32>,
    %c4_51 = arith.constant 4 : index
    %c126_52 = arith.constant 126 : index
    %48 = vector.load %arg6[%c4_51, %c126_52] : memref<12x288xf32, #tpu.memory_space<vmem>>, vector<4x18xf32>
    tpu.vector_store %arg6[%c4_51, %c126_52], %46 {strides = array<i32>} : memref<12x288xf32, #tpu.memory_space<vmem>>, vector<4x18xf32>,
    %c8_53 = arith.constant 8 : index
    %c108_54 = arith.constant 108 : index
    %49 = vector.load %arg6[%c8_53, %c108_54] : memref<12x288xf32, #tpu.memory_space<vmem>>, vector<4x18xf32>
    tpu.vector_store %arg6[%c8_53, %c108_54], %46 {strides = array<i32>} : memref<12x288xf32, #tpu.memory_space<vmem>>, vector<4x18xf32>,
    %c0_55 = arith.constant 0 : index
    %c0_56 = arith.constant 0 : index
    %c128 = arith.constant 128 : index
    %50 = vector.load %arg2[%c0_55, %c0_56, %c128] : memref<1x4x256xf32, #tpu.memory_space<vmem>>, vector<1x4x16xf32>
    %51 = vector.shape_cast %50 : vector<1x4x16xf32> to vector<4x16xf32>
    %52 = tpu.concatenate %0, %51, %0 in 1 : vector<4x1xf32>, vector<4x16xf32>, vector<4x1xf32> -> vector<4x18xf32>
    %c0_57 = arith.constant 0 : index
    %c162 = arith.constant 162 : index
    %53 = vector.load %arg6[%c0_57, %c162] : memref<12x288xf32, #tpu.memory_space<vmem>>, vector<4x18xf32>
    tpu.vector_store %arg6[%c0_57, %c162], %52 {strides = array<i32>} : memref<12x288xf32, #tpu.memory_space<vmem>>, vector<4x18xf32>,
    %c4_58 = arith.constant 4 : index
    %c144_59 = arith.constant 144 : index
    %54 = vector.load %arg6[%c4_58, %c144_59] : memref<12x288xf32, #tpu.memory_space<vmem>>, vector<4x18xf32>
    tpu.vector_store %arg6[%c4_58, %c144_59], %52 {strides = array<i32>} : memref<12x288xf32, #tpu.memory_space<vmem>>, vector<4x18xf32>,
    %c8_60 = arith.constant 8 : index
    %c126_61 = arith.constant 126 : index
    %55 = vector.load %arg6[%c8_60, %c126_61] : memref<12x288xf32, #tpu.memory_space<vmem>>, vector<4x18xf32>
    tpu.vector_store %arg6[%c8_60, %c126_61], %52 {strides = array<i32>} : memref<12x288xf32, #tpu.memory_space<vmem>>, vector<4x18xf32>,
    %c0_62 = arith.constant 0 : index
    %c0_63 = arith.constant 0 : index
    %c144_64 = arith.constant 144 : index
    %56 = vector.load %arg2[%c0_62, %c0_63, %c144_64] : memref<1x4x256xf32, #tpu.memory_space<vmem>>, vector<1x4x16xf32>
    %57 = vector.shape_cast %56 : vector<1x4x16xf32> to vector<4x16xf32>
    %58 = tpu.concatenate %0, %57, %0 in 1 : vector<4x1xf32>, vector<4x16xf32>, vector<4x1xf32> -> vector<4x18xf32>
    %c0_65 = arith.constant 0 : index
    %c180 = arith.constant 180 : index
    %59 = vector.load %arg6[%c0_65, %c180] : memref<12x288xf32, #tpu.memory_space<vmem>>, vector<4x18xf32>
    tpu.vector_store %arg6[%c0_65, %c180], %58 {strides = array<i32>} : memref<12x288xf32, #tpu.memory_space<vmem>>, vector<4x18xf32>,
    %c4_66 = arith.constant 4 : index
    %c162_67 = arith.constant 162 : index
    %60 = vector.load %arg6[%c4_66, %c162_67] : memref<12x288xf32, #tpu.memory_space<vmem>>, vector<4x18xf32>
    tpu.vector_store %arg6[%c4_66, %c162_67], %58 {strides = array<i32>} : memref<12x288xf32, #tpu.memory_space<vmem>>, vector<4x18xf32>,
    %c8_68 = arith.constant 8 : index
    %c144_69 = arith.constant 144 : index
    %61 = vector.load %arg6[%c8_68, %c144_69] : memref<12x288xf32, #tpu.memory_space<vmem>>, vector<4x18xf32>
    tpu.vector_store %arg6[%c8_68, %c144_69], %58 {strides = array<i32>} : memref<12x288xf32, #tpu.memory_space<vmem>>, vector<4x18xf32>,
    %c0_70 = arith.constant 0 : index
    %c0_71 = arith.constant 0 : index
    %c160 = arith.constant 160 : index
    %62 = vector.load %arg2[%c0_70, %c0_71, %c160] : memref<1x4x256xf32, #tpu.memory_space<vmem>>, vector<1x4x16xf32>
    %63 = vector.shape_cast %62 : vector<1x4x16xf32> to vector<4x16xf32>
    %64 = tpu.concatenate %0, %63, %0 in 1 : vector<4x1xf32>, vector<4x16xf32>, vector<4x1xf32> -> vector<4x18xf32>
    %c0_72 = arith.constant 0 : index
    %c198 = arith.constant 198 : index
    %65 = vector.load %arg6[%c0_72, %c198] : memref<12x288xf32, #tpu.memory_space<vmem>>, vector<4x18xf32>
    tpu.vector_store %arg6[%c0_72, %c198], %64 {strides = array<i32>} : memref<12x288xf32, #tpu.memory_space<vmem>>, vector<4x18xf32>,
    %c4_73 = arith.constant 4 : index
    %c180_74 = arith.constant 180 : index
    %66 = vector.load %arg6[%c4_73, %c180_74] : memref<12x288xf32, #tpu.memory_space<vmem>>, vector<4x18xf32>
    tpu.vector_store %arg6[%c4_73, %c180_74], %64 {strides = array<i32>} : memref<12x288xf32, #tpu.memory_space<vmem>>, vector<4x18xf32>,
    %c8_75 = arith.constant 8 : index
    %c162_76 = arith.constant 162 : index
    %67 = vector.load %arg6[%c8_75, %c162_76] : memref<12x288xf32, #tpu.memory_space<vmem>>, vector<4x18xf32>
    tpu.vector_store %arg6[%c8_75, %c162_76], %64 {strides = array<i32>} : memref<12x288xf32, #tpu.memory_space<vmem>>, vector<4x18xf32>,
    %c0_77 = arith.constant 0 : index
    %c0_78 = arith.constant 0 : index
    %c176 = arith.constant 176 : index
    %68 = vector.load %arg2[%c0_77, %c0_78, %c176] : memref<1x4x256xf32, #tpu.memory_space<vmem>>, vector<1x4x16xf32>
    %69 = vector.shape_cast %68 : vector<1x4x16xf32> to vector<4x16xf32>
    %70 = tpu.concatenate %0, %69, %0 in 1 : vector<4x1xf32>, vector<4x16xf32>, vector<4x1xf32> -> vector<4x18xf32>
    %c0_79 = arith.constant 0 : index
    %c216 = arith.constant 216 : index
    %71 = vector.load %arg6[%c0_79, %c216] : memref<12x288xf32, #tpu.memory_space<vmem>>, vector<4x18xf32>
    tpu.vector_store %arg6[%c0_79, %c216], %70 {strides = array<i32>} : memref<12x288xf32, #tpu.memory_space<vmem>>, vector<4x18xf32>,
    %c4_80 = arith.constant 4 : index
    %c198_81 = arith.constant 198 : index
    %72 = vector.load %arg6[%c4_80, %c198_81] : memref<12x288xf32, #tpu.memory_space<vmem>>, vector<4x18xf32>
    tpu.vector_store %arg6[%c4_80, %c198_81], %70 {strides = array<i32>} : memref<12x288xf32, #tpu.memory_space<vmem>>, vector<4x18xf32>,
    %c8_82 = arith.constant 8 : index
    %c180_83 = arith.constant 180 : index
    %73 = vector.load %arg6[%c8_82, %c180_83] : memref<12x288xf32, #tpu.memory_space<vmem>>, vector<4x18xf32>
    tpu.vector_store %arg6[%c8_82, %c180_83], %70 {strides = array<i32>} : memref<12x288xf32, #tpu.memory_space<vmem>>, vector<4x18xf32>,
    %c0_84 = arith.constant 0 : index
    %c0_85 = arith.constant 0 : index
    %c192 = arith.constant 192 : index
    %74 = vector.load %arg2[%c0_84, %c0_85, %c192] : memref<1x4x256xf32, #tpu.memory_space<vmem>>, vector<1x4x16xf32>
    %75 = vector.shape_cast %74 : vector<1x4x16xf32> to vector<4x16xf32>
    %76 = tpu.concatenate %0, %75, %0 in 1 : vector<4x1xf32>, vector<4x16xf32>, vector<4x1xf32> -> vector<4x18xf32>
    %c0_86 = arith.constant 0 : index
    %c234 = arith.constant 234 : index
    %77 = vector.load %arg6[%c0_86, %c234] : memref<12x288xf32, #tpu.memory_space<vmem>>, vector<4x18xf32>
    tpu.vector_store %arg6[%c0_86, %c234], %76 {strides = array<i32>} : memref<12x288xf32, #tpu.memory_space<vmem>>, vector<4x18xf32>,
    %c4_87 = arith.constant 4 : index
    %c216_88 = arith.constant 216 : index
    %78 = vector.load %arg6[%c4_87, %c216_88] : memref<12x288xf32, #tpu.memory_space<vmem>>, vector<4x18xf32>
    tpu.vector_store %arg6[%c4_87, %c216_88], %76 {strides = array<i32>} : memref<12x288xf32, #tpu.memory_space<vmem>>, vector<4x18xf32>,
    %c8_89 = arith.constant 8 : index
    %c198_90 = arith.constant 198 : index
    %79 = vector.load %arg6[%c8_89, %c198_90] : memref<12x288xf32, #tpu.memory_space<vmem>>, vector<4x18xf32>
    tpu.vector_store %arg6[%c8_89, %c198_90], %76 {strides = array<i32>} : memref<12x288xf32, #tpu.memory_space<vmem>>, vector<4x18xf32>,
    %c0_91 = arith.constant 0 : index
    %c0_92 = arith.constant 0 : index
    %c208 = arith.constant 208 : index
    %80 = vector.load %arg2[%c0_91, %c0_92, %c208] : memref<1x4x256xf32, #tpu.memory_space<vmem>>, vector<1x4x16xf32>
    %81 = vector.shape_cast %80 : vector<1x4x16xf32> to vector<4x16xf32>
    %82 = tpu.concatenate %0, %81, %0 in 1 : vector<4x1xf32>, vector<4x16xf32>, vector<4x1xf32> -> vector<4x18xf32>
    %c0_93 = arith.constant 0 : index
    %c252 = arith.constant 252 : index
    %83 = vector.load %arg6[%c0_93, %c252] : memref<12x288xf32, #tpu.memory_space<vmem>>, vector<4x18xf32>
    tpu.vector_store %arg6[%c0_93, %c252], %82 {strides = array<i32>} : memref<12x288xf32, #tpu.memory_space<vmem>>, vector<4x18xf32>,
    %c4_94 = arith.constant 4 : index
    %c234_95 = arith.constant 234 : index
    %84 = vector.load %arg6[%c4_94, %c234_95] : memref<12x288xf32, #tpu.memory_space<vmem>>, vector<4x18xf32>
    tpu.vector_store %arg6[%c4_94, %c234_95], %82 {strides = array<i32>} : memref<12x288xf32, #tpu.memory_space<vmem>>, vector<4x18xf32>,
    %c8_96 = arith.constant 8 : index
    %c216_97 = arith.constant 216 : index
    %85 = vector.load %arg6[%c8_96, %c216_97] : memref<12x288xf32, #tpu.memory_space<vmem>>, vector<4x18xf32>
    tpu.vector_store %arg6[%c8_96, %c216_97], %82 {strides = array<i32>} : memref<12x288xf32, #tpu.memory_space<vmem>>, vector<4x18xf32>,
    %c0_98 = arith.constant 0 : index
    %c0_99 = arith.constant 0 : index
    %c224 = arith.constant 224 : index
    %86 = vector.load %arg2[%c0_98, %c0_99, %c224] : memref<1x4x256xf32, #tpu.memory_space<vmem>>, vector<1x4x16xf32>
    %87 = vector.shape_cast %86 : vector<1x4x16xf32> to vector<4x16xf32>
    %88 = tpu.concatenate %0, %87, %0 in 1 : vector<4x1xf32>, vector<4x16xf32>, vector<4x1xf32> -> vector<4x18xf32>
    %c0_100 = arith.constant 0 : index
    %c270 = arith.constant 270 : index
    %89 = vector.load %arg6[%c0_100, %c270] : memref<12x288xf32, #tpu.memory_space<vmem>>, vector<4x18xf32>
    tpu.vector_store %arg6[%c0_100, %c270], %88 {strides = array<i32>} : memref<12x288xf32, #tpu.memory_space<vmem>>, vector<4x18xf32>,
    %c4_101 = arith.constant 4 : index
    %c252_102 = arith.constant 252 : index
    %90 = vector.load %arg6[%c4_101, %c252_102] : memref<12x288xf32, #tpu.memory_space<vmem>>, vector<4x18xf32>
    tpu.vector_store %arg6[%c4_101, %c252_102], %88 {strides = array<i32>} : memref<12x288xf32, #tpu.memory_space<vmem>>, vector<4x18xf32>,
    %c8_103 = arith.constant 8 : index
    %c234_104 = arith.constant 234 : index
    %91 = vector.load %arg6[%c8_103, %c234_104] : memref<12x288xf32, #tpu.memory_space<vmem>>, vector<4x18xf32>
    tpu.vector_store %arg6[%c8_103, %c234_104], %88 {strides = array<i32>} : memref<12x288xf32, #tpu.memory_space<vmem>>, vector<4x18xf32>,
    %c0_105 = arith.constant 0 : index
    %c0_106 = arith.constant 0 : index
    %c240 = arith.constant 240 : index
    %92 = vector.load %arg2[%c0_105, %c0_106, %c240] : memref<1x4x256xf32, #tpu.memory_space<vmem>>, vector<1x4x16xf32>
    %93 = vector.shape_cast %92 : vector<1x4x16xf32> to vector<4x16xf32>
    %94 = tpu.concatenate %0, %93, %0 in 1 : vector<4x1xf32>, vector<4x16xf32>, vector<4x1xf32> -> vector<4x18xf32>
    %c4_107 = arith.constant 4 : index
    %c270_108 = arith.constant 270 : index
    %95 = vector.load %arg6[%c4_107, %c270_108] : memref<12x288xf32, #tpu.memory_space<vmem>>, vector<4x18xf32>
    tpu.vector_store %arg6[%c4_107, %c270_108], %94 {strides = array<i32>} : memref<12x288xf32, #tpu.memory_space<vmem>>, vector<4x18xf32>,
    %c8_109 = arith.constant 8 : index
    %c252_110 = arith.constant 252 : index
    %96 = vector.load %arg6[%c8_109, %c252_110] : memref<12x288xf32, #tpu.memory_space<vmem>>, vector<4x18xf32>
    tpu.vector_store %arg6[%c8_109, %c252_110], %94 {strides = array<i32>} : memref<12x288xf32, #tpu.memory_space<vmem>>, vector<4x18xf32>,
    %c8_111 = arith.constant 8 : index
    %c270_112 = arith.constant 270 : index
    %97 = vector.load %arg6[%c8_111, %c270_112] : memref<12x288xf32, #tpu.memory_space<vmem>>, vector<4x18xf32>
    tpu.vector_store %arg6[%c8_111, %c270_112], %1 {strides = array<i32>} : memref<12x288xf32, #tpu.memory_space<vmem>>, vector<4x18xf32>,
    %c0_113 = arith.constant 0 : index
    %c0_114 = arith.constant 0 : index
    %98 = vector.load %arg6[%c0_113, %c0_114] : memref<12x288xf32, #tpu.memory_space<vmem>>, vector<12x288xf32>
    %c0_115 = arith.constant 0 : index
    %c0_116 = arith.constant 0 : index
    %c0_117 = arith.constant 0 : index
    %99 = vector.load %arg3[%c0_115, %c0_116, %c0_117] : memref<3x12x12xf32, #tpu.memory_space<vmem>>, vector<1x12x12xf32>
    %100 = vector.shape_cast %99 : vector<1x12x12xf32> to vector<12x12xf32>
    %cst_118 = arith.constant dense<0.000000e+00> : vector<12x288xf32>
    %101 = tpu.matmul %100, %98, %cst_118 {dimension_numbers = #tpu.dot_dimension_numbers<[1], [0], [0], [1], [0, 0, 1, 1], [], []>} : vector<12x12xf32>, vector<12x288xf32>, vector<12x288xf32> -> vector<12x288xf32>
    %c1 = arith.constant 1 : index
    %c0_119 = arith.constant 0 : index
    %c0_120 = arith.constant 0 : index
    %102 = vector.load %arg3[%c1, %c0_119, %c0_120] : memref<3x12x12xf32, #tpu.memory_space<vmem>>, vector<1x12x12xf32>
    %103 = vector.shape_cast %102 : vector<1x12x12xf32> to vector<12x12xf32>
    %cst_121 = arith.constant dense<0.000000e+00> : vector<12x288xf32>
    %104 = tpu.matmul %103, %98, %cst_121 {dimension_numbers = #tpu.dot_dimension_numbers<[1], [0], [0], [1], [0, 0, 1, 1], [], []>} : vector<12x12xf32>, vector<12x288xf32>, vector<12x288xf32> -> vector<12x288xf32>
    %c2 = arith.constant 2 : index
    %c0_122 = arith.constant 0 : index
    %c0_123 = arith.constant 0 : index
    %105 = vector.load %arg3[%c2, %c0_122, %c0_123] : memref<3x12x12xf32, #tpu.memory_space<vmem>>, vector<1x12x12xf32>
    %106 = vector.shape_cast %105 : vector<1x12x12xf32> to vector<12x12xf32>
    %cst_124 = arith.constant dense<0.000000e+00> : vector<12x288xf32>
    %107 = tpu.matmul %106, %98, %cst_124 {dimension_numbers = #tpu.dot_dimension_numbers<[1], [0], [0], [1], [0, 0, 1, 1], [], []>} : vector<12x12xf32>, vector<12x288xf32>, vector<12x288xf32> -> vector<12x288xf32>
    %cst_125 = arith.constant 0.000000e+00 : f32
    %108 = vector.broadcast %cst_125 : f32 to vector<12x1xf32>
    %109 = vector.extract_strided_slice %104 {offsets = [0, 1], sizes = [12, 287], strides = [1, 1]} : vector<12x288xf32> to vector<12x287xf32>
    %110 = tpu.concatenate %109, %108 in 1 : vector<12x287xf32>, vector<12x1xf32> -> vector<12x288xf32>
    %111 = arith.addf %101, %110 : vector<12x288xf32>
    %cst_126 = arith.constant 0.000000e+00 : f32
    %112 = vector.broadcast %cst_126 : f32 to vector<12x2xf32>
    %113 = vector.extract_strided_slice %107 {offsets = [0, 2], sizes = [12, 286], strides = [1, 1]} : vector<12x288xf32> to vector<12x286xf32>
    %114 = tpu.concatenate %113, %112 in 1 : vector<12x286xf32>, vector<12x2xf32> -> vector<12x288xf32>
    %115 = arith.addf %111, %114 : vector<12x288xf32>
    %c0_127 = arith.constant 0 : index
    %c0_128 = arith.constant 0 : index
    %116 = vector.load %arg4[%c0_127, %c0_128] : memref<12x1xf32, #tpu.memory_space<vmem>>, vector<12x1xf32>
    %117 = vector.broadcast %116 : vector<12x1xf32> to vector<12x288xf32>
    %118 = arith.addf %115, %117 : vector<12x288xf32>
    %c0_129 = arith.constant 0 : index
    %c0_130 = arith.constant 0 : index
    %c0_131 = arith.constant 0 : index
    %119 = vector.load %arg5[%c0_129, %c0_130, %c0_131] : memref<1x12x288xf32, #tpu.memory_space<vmem>>, vector<1x12x288xf32>
    %120 = vector.shape_cast %119 : vector<1x12x288xf32> to vector<12x288xf32>
    %121 = vector.shape_cast %118 : vector<12x288xf32> to vector<1x12x288xf32>
    tpu.vector_store %arg5[%c0_129, %c0_130, %c0_131], %121 {strides = array<i32>} : memref<1x12x288xf32, #tpu.memory_space<vmem>>, vector<1x12x288xf32>,
    return
  }
  func.func @transform_0(%arg0: i32, %arg1: i32) -> (i32, i32, i32) {
    %c0_i32 = arith.constant 0 : i32
    %c0_i32_0 = arith.constant 0 : i32
    %c0_i32_1 = arith.constant 0 : i32
    return %arg0, %c0_i32, %c0_i32_0 : i32, i32, i32
  }
  func.func @transform_1(%arg0: i32, %arg1: i32) -> (i32, i32, i32) {
    %c0_i32 = arith.constant 0 : i32
    %c0_i32_0 = arith.constant 0 : i32
    %c0_i32_1 = arith.constant 0 : i32
    %c0_i32_2 = arith.constant 0 : i32
    return %c0_i32, %c0_i32_0, %c0_i32_1 : i32, i32, i32
  }
  func.func @transform_2(%arg0: i32, %arg1: i32) -> (i32, i32) {
    %c0_i32 = arith.constant 0 : i32
    %c0_i32_0 = arith.constant 0 : i32
    %c0_i32_1 = arith.constant 0 : i32
    return %c0_i32, %c0_i32_0 : i32, i32
  }
  func.func @transform_3(%arg0: i32, %arg1: i32) -> (i32, i32, i32) {
    %c0_i32 = arith.constant 0 : i32
    %c0_i32_0 = arith.constant 0 : i32
    return %arg0, %c0_i32, %arg1 : i32, i32, i32
  }
}

</mosaic_0001>

<bundles_post_ra>
// kernel: upsample_one_step.1
= control target key start
LH: loop header
LB: loop body
LE: loop exit
PB: predicated region body
PF: predicated region fallthrough
CT: control target
= control target key end

     0   :  { %s1469_s12 = smov 0   ;;  %s1471_s13 = smov 0   ;;  %s1745_s0 = inlined_call_operand.vmem [shape: f32[2,4,256], index: 0, kind: input, shape index: {}]   ;;  %s1746_s1 = inlined_call_operand.vmem [shape: f32[3,12,12], index: 1, kind: input, shape index: {}]   ;;  %s1747_s2 = inlined_call_operand.vmem [shape: f32[12,1], index: 2, kind: input, shape index: {}]   ;;  %s1748_s3 = inlined_call_operand.vmem [shape: f32[2,12,288], index: 3, kind: output, shape index: {}]  }
   0x1   :  { %s1473_s14 = smov 0  }
   0x2 LB: > { %s25_s15 = sadd.s32 1, %s1416_s13  ;;  %p1243_p0 = scmp.ge.s32.totalorder %s1420_s14, 1  ;;  %s1420_s14 = sphi %s1473_s14, %s13_s14   ;;  %s1416_s13 = sphi %s1471_s13, %s1752_s13   ;;  %s1412_s12 = sphi %s1469_s12, %s1751_s12  }
   0x3   : > { %p27_p1 = scmp.ge.s32.totalorder %s25_s15, 2  ;;  %p151_p2 = scmp.lt.s32.totalorder %s1420_s14, 3 }
   0x5   : > { %s1754_s15 = smov (%p27_p1, %s25_s15), 0  ;;  %p152_p3 = pnand %p1243_p0, %p151_p2 }
   0x6   : > { %p179_p4 = scmp.lt.s32.totalorder (!%p152_p3), %s1412_s12, 1  ;;  %s1422_s20 = smov (!%p152_p3), 17   ;;  %vm201_vm0 = vcmask (!%p152_p3), 7168   ;;  %vm203_vm1 = vcmask (!%p152_p3), 138240   ;;  %vm194_vm2 = vcmask (!%p152_p3), 142336   ;;  %v1430_v18 = vmov (!%p152_p3), 0.0  }
   0x7   : > { %155 = sbr.rel (%p152_p3) target bundleno = 707 (0x2c3), region = 32  ;;  %s1423_s21 = smov (!%p152_p3), 113   ;;  %195 = vst.msk [vmem:[#allocation2] sm:$0xf] (!%p152_p3), %vm194_vm2, %v1430_v18  ;;  %655 = vmatprep.mubr.f32.mxu0 (!%p152_p3), %v1430_v18  ;;  %vm213_vm3 = vcmask (!%p152_p3), 146436   ;;  %vm574_vm4 = vcmask (!%p152_p3), 97280  }
   0x8   : > { %s1424_s22 = smov (!%p152_p3), 1   ;;  %s1425_s23 = smov (!%p152_p3), 33   ;;  %vm340_vm5 = vcmask (!%p152_p3), 125952   ;;  %vm363_vm6 = vcmask (!%p152_p3), 273536   ;;  %vm209_vm7 = vcmask (!%p152_p3), 289936   ;;  %vm388_vm8 = vcmask (!%p152_p3), 421136  }
   0x9   : > { %s1426_s24 = smov (!%p152_p3), 97   ;;  %s1427_s25 = smov (!%p152_p3), 81   ;;  %vm226_vm9 = vcmask (!%p152_p3), 437536   ;;  %vm412_vm10 = vcmask (!%p152_p3), 568736   ;;  %vm246_vm11 = vcmask (!%p152_p3), 585136   ;;  %vm435_vm12 = vcmask (!%p152_p3), 716336  }
   0xa   : > { %s1428_s26 = smov (!%p152_p3), 65   ;;  %s1429_s27 = smov (!%p152_p3), 49   ;;  %vm269_vm13 = vcmask (!%p152_p3), 732736   ;;  %vm458_vm14 = vcmask (!%p152_p3), 863936   ;;  %vm292_vm15 = vcmask (!%p152_p3), 880336  }
   0xb   : > { %s1431_s28 = smov (!%p152_p3), 16   ;;  %s1432_s29 = smov (!%p152_p3), 126  }
   0xc   : > { %s1433_s30 = smov (!%p152_p3), 34   ;;  %s1434_s4 = smov (!%p152_p3), 18  }
   0xd   : > { %s1435_s5 = smov (!%p152_p3), 52   ;;  %s1436_s6 = smov (!%p152_p3), 36  }
   0xe   : > { %s1756_s12 = smov (!%p179_p4, %s1412_s12), 1  ;;  %s1437_s7 = smov 54  }
   0xf   : > { %s1274_s16 = sshll.u32 %s1756_s12, 3  ;;  %s1438_s8 = smov 70  }
  0x10   : > { %s1493_s19 = scalar_lea.vmem %s1745_s0, %s1274_s16  ;;  %s1439_s9 = smov 72  }
  0x11   : > { %v352_v0 = vld [vmem:[%s1493_s19] sm:$0xf]  ;;  %v377_v2 = vld [vmem:[%s1493_s19 + $0x4] sm:$0xf]  ;;  %s1440_s10 = smov 88   ;;  %s1441_s11 = smov 90  }
  0x12   : > { %v215_v1 = vld [vmem:[%s1493_s19] sm:$0xf]  ;;  %354 = vrot.lane.b32.xlu0 %v352_v0, %s1422_s20  ;;  %v401_v4 = vld [vmem:[%s1493_s19 + $0x4] sm:$0xf]  ;;  %s1442_s16 = smov 106   ;;  %s1443_s17 = smov 124  }
  0x13   : > { %217 = vrot.lane.b32.xlu1 %v215_v1, %s1423_s21  ;;  %v327_v3 = vld [vmem:[%s1493_s19] sm:$0xf]  ;;  %v424_v7 = vld [vmem:[%s1493_s19 + $0x4] sm:$0xf]  ;;  %s1444_s18 = smov 108  }
  0x14   : > { %v235_v5 = vld [vmem:[%s1493_s19] sm:$0xf]  ;;  %v447_v9 = vld [vmem:[%s1493_s19 + $0x4] sm:$0xf] }
  0x15   : > { %v196_v6 = vld [vmem:[%s1493_s19] sm:$0xf]  ;;  %v470_v11 = vld [vmem:[%s1493_s19 + $0x4] sm:$0xf] }
  0x16   : > { %379 = vrot.lane.b32.xlu0 %v377_v2, %s1424_s22  ;;  %v258_v8 = vld [vmem:[%s1493_s19] sm:$0xf]  ;;  %v493_v13 = vld [vmem:[%s1493_s19 + $0x4] sm:$0xf] }
  0x17   : > { %329 = vrot.lane.b32.xlu1 %v327_v3, %s1425_s23  ;;  %v281_v10 = vld [vmem:[%s1493_s19] sm:$0xf]  ;;  %v518_v14 = vld [vmem:[%s1493_s19 + $0x4] sm:$0xf] }
  0x18   : > { %v304_v12 = vld [vmem:[%s1493_s19] sm:$0xf]  ;;  %v543_v15 = vld [vmem:[%s1493_s19 + $0x4] sm:$0xf] }
  0x1a   : > { %403 = vrot.lane.b32.xlu0 %v401_v4, %s1423_s21  ;;  %s1445_s21 = smov 14  }
  0x1b   : > { %237 = vrot.lane.b32.xlu1 %v235_v5, %s1426_s24 }
  0x1e   : > { %426 = vrot.lane.b32.xlu0 %v424_v7, %s1426_s24 }
  0x1f   : > { %198 = vrot.lane.b32.xlu1 %v196_v6, %s1424_s22 }
  0x22   : > { %260 = vrot.lane.b32.xlu0 %v258_v8, %s1427_s25 }
  0x23   : > { %449 = vrot.lane.b32.xlu1 %v447_v9, %s1427_s25 }
  0x26   : > { %283 = vrot.lane.b32.xlu0 %v281_v10, %s1428_s26 }
  0x27   : > { %472 = vrot.lane.b32.xlu1 %v470_v11, %s1428_s26 }
  0x2a   : > { %306 = vrot.lane.b32.xlu0 %v304_v12, %s1429_s27 }
  0x2b   : > { %495 = vrot.lane.b32.xlu1 %v493_v13, %s1429_s27 }
  0x2e   : > { %520 = vrot.lane.b32.xlu0 %v518_v14, %s1425_s23 }
  0x2f   : > { %545 = vrot.lane.b32.xlu1 %v543_v15, %s1422_s20 }
  0x84   : > { %v355_v16 = vpop.permute.xlu0 %354 }
  0x85   : > { %v218_v17 = vpop.permute.xlu1 %217  ;;  %v357_v19 = vsel %vm201_vm0, 0.0, %v355_v16  ;;  %v1627_v16 = vld [vmem:[%s1746_s1 + $0x10] sm:$0xff] }
  0x86   : > { %v220_v20 = vsel %vm201_vm0, 0.0, %v218_v17  ;;  %v1518_v21 = vsel %vm203_vm1, %v357_v19, 0.0  ;;  %1291 = vmatprep.mubr.msk.f32.mxu1 %vm574_vm4, %v1627_v16  ;;  %v1132_v19 = vld [vmem:[%s1747_s2] sm:$0xff] }
  0x87   : > { %v1521_v22 = vsel %vm203_vm1, %v220_v20, 0.0  ;;  %360 = vrot.lane.b32.xlu1 %v1518_v21, %s1431_s28  ;;  %v365_v2 = vrot.slane %v1518_v21, 4  ;;  %v1133_v20 = vld [vmem:[%s1747_s2 + $0x8] sm:$0xf] }
  0x88   : > { %234 = vst.msk [vmem:[#allocation2 + $0x18] sm:$0xf] %vm194_vm2, %v1521_v22  ;;  %v380_v23 = vpop.permute.xlu0 %379  ;;  %v228_v4 = vrot.slane %v1521_v22, 4  ;;  %vm506_vm2 = vcmask 109568  }
  0x89   : > { %v330_v24 = vpop.permute.xlu1 %329  ;;  %v382_v27 = vsel %vm201_vm0, 0.0, %v380_v23 }
  0x8a   : > { %v332_v25 = vsel %vm201_vm0, 0.0, %v330_v24  ;;  %v1535_v31 = vsel %vm203_vm1, %v382_v27, 0.0 }
  0x8b   : > { %v1528_v26 = vsel %vm203_vm1, %v332_v25, 0.0  ;;  %v390_v3 = vrot.slane %v1535_v31, 4 }
  0x8c   : > { %335 = vrot.lane.b32.xlu0 %v1528_v26, %s1432_s29  ;;  %v404_v28 = vpop.permute.xlu0 %403  ;;  %v342_v14 = vrot.slane %v1528_v26, 4 }
  0x8d   : > { %v238_v29 = vpop.permute.xlu1 %237  ;;  %v406_v30 = vsel %vm201_vm0, 0.0, %v404_v28 }
  0x8e   : > { %v1538_v32 = vsel %vm203_vm1, %v406_v30, 0.0  ;;  %v240_v38 = vsel %vm201_vm0, 0.0, %v238_v29 }
  0x8f   : > { %420 = vrot.lane.b32.xlu1 %v1538_v32, %s1431_s28  ;;  %v1555_v41 = vsel %vm203_vm1, %v240_v38, 0.0  ;;  %v414_v5 = vrot.slane %v1538_v32, 4 }
  0x90   : > { %396 = vrot.lane.b32.xlu0 %v1535_v31, %s1432_s29  ;;  %v427_v34 = vpop.permute.xlu0 %426  ;;  %v248_v6 = vrot.slane %v1555_v41, 4 }
  0x91   : > { %v199_v33 = vpop.permute.xlu1 %198  ;;  %v429_v36 = vsel %vm201_vm0, 0.0, %v427_v34 }
  0x92   : > { %v202_v35 = vsel %vm201_vm0, 0.0, %v199_v33  ;;  %v1552_v40 = vsel %vm203_vm1, %v429_v36, 0.0 }
  0x93   : > { %v204_v37 = vsel %vm203_vm1, %v202_v35, 0.0  ;;  %385 = vrot.lane.b32.xlu1 %v1535_v31, %s1433_s30  ;;  %v437_v7 = vrot.slane %v1552_v40, 4 }
  0x94   : > { %v211_v39 = vrot.slane %v204_v37, 4  ;;  %206 = vrot.lane.b32.xlu0 %v204_v37, %s1434_s4  ;;  %v261_v42 = vpop.permute.xlu0 %260 }
  0x95   : > { %v450_v43 = vpop.permute.xlu1 %449  ;;  %v263_v44 = vsel %vm201_vm0, 0.0, %v261_v42 }
  0x96   : > { %214 = vst.msk [vmem:[#allocation2] sm:$0xf0] %vm213_vm3, %v211_v39  ;;  %v452_v45 = vsel %vm201_vm0, 0.0, %v450_v43  ;;  %v264_v46 = vsel %vm203_vm1, %v263_v44, 0.0  ;;  %vm315_vm3 = vcmask 1027936  }
  0x97   : > { %443 = vrot.lane.b32.xlu1 %v1552_v40, %s1433_s30  ;;  %v453_v47 = vsel %vm203_vm1, %v452_v45, 0.0  ;;  %v271_v8 = vrot.slane %v264_v46, 4 }
  0x98   : > { %254 = vrot.lane.b32.xlu0 %v1555_v41, %s1434_s4  ;;  %v284_v48 = vpop.permute.xlu0 %283  ;;  %v460_v9 = vrot.slane %v453_v47, 4 }
  0x99   : > { %v473_v49 = vpop.permute.xlu1 %472  ;;  %v286_v50 = vsel %vm201_vm0, 0.0, %v284_v48 }
  0x9a   : > { %v475_v51 = vsel %vm201_vm0, 0.0, %v473_v49  ;;  %v287_v52 = vsel %vm203_vm1, %v286_v50, 0.0 }
  0x9b   : > { %409 = vrot.lane.b32.xlu1 %v1538_v32, %s1435_s5  ;;  %v476_v53 = vsel %vm203_vm1, %v475_v51, 0.0  ;;  %v294_v10 = vrot.slane %v287_v52, 4 }
  0x9c   : > { %223 = vrot.lane.b32.xlu0 %v1521_v22, %s1436_s6  ;;  %v307_v54 = vpop.permute.xlu0 %306  ;;  %v483_v11 = vrot.slane %v476_v53, 4 }
  0x9d   : > { %v496_v55 = vpop.permute.xlu1 %495  ;;  %v309_v56 = vsel %vm201_vm0, 0.0, %v307_v54 }
  0x9e   : > { %v498_v57 = vsel %vm201_vm0, 0.0, %v496_v55  ;;  %v310_v58 = vsel %vm203_vm1, %v309_v56, 0.0 }
  0x9f   : > { %466 = vrot.lane.b32.xlu1 %v453_v47, %s1435_s5  ;;  %v499_v59 = vsel %vm203_vm1, %v498_v57, 0.0  ;;  %v317_v12 = vrot.slane %v310_v58, 4 }
  0xa0   : > { %277 = vrot.lane.b32.xlu0 %v264_v46, %s1436_s6  ;;  %v521_v60 = vpop.permute.xlu0 %520  ;;  %v508_v15 = vrot.slane %v499_v59, 4 }
  0xa1   : > { %v523_v61 = vsel %vm201_vm0, 0.0, %v521_v60  ;;  %v546_v63 = vpop.permute.xlu1 %545 }
  0xa2   : > { %v524_v62 = vsel %vm203_vm1, %v523_v61, 0.0  ;;  %v548_v0 = vsel %vm201_vm0, 0.0, %v546_v63  ;;  %vm481_vm0 = vcmask 1011536  }
  0xa3   : > { %432 = vrot.lane.b32.xlu1 %v1552_v40, %s1438_s8  ;;  %v549_v1 = vsel %vm203_vm1, %v548_v0, 0.0  ;;  %v531_v13 = vrot.slane %v524_v62, 4  ;;  %vm504_vm1 = vcmask 1044448  }
  0xa4   : > { %243 = vrot.lane.b32.xlu0 %v1555_v41, %s1437_s7  ;;  %v551_v17 = vrot.slane %v549_v1, 4 }
  0xa7   : > { %489 = vrot.lane.b32.xlu1 %v476_v53, %s1438_s8 }
  0xa8   : > { %300 = vrot.lane.b32.xlu0 %v287_v52, %s1437_s7 }
  0xab   : > { %455 = vrot.lane.b32.xlu1 %v453_v47, %s1440_s10 }
  0xac   : > { %266 = vrot.lane.b32.xlu0 %v264_v46, %s1439_s9 }
  0xaf   : > { %514 = vrot.lane.b32.xlu1 %v499_v59, %s1440_s10 }
  0xb0   : > { %323 = vrot.lane.b32.xlu0 %v310_v58, %s1439_s9 }
  0xb3   : > { %478 = vrot.lane.b32.xlu1 %v476_v53, %s1442_s16 }
  0xb4   : > { %289 = vrot.lane.b32.xlu0 %v287_v52, %s1441_s11 }
  0xb7   : > { %539 = vrot.lane.b32.xlu1 %v524_v62, %s1442_s16 }
  0xb8   : > { %348 = vrot.lane.b32.xlu0 %v1528_v26, %s1441_s11 }
  0xbb   : > { %312 = vrot.lane.b32.xlu1 %v310_v58, %s1444_s18 }
  0xbc   : > { %501 = vrot.lane.b32.xlu0 %v499_v59, %s1443_s17 }
  0xbf   : > { %373 = vrot.lane.b32.xlu1 %v1518_v21, %s1444_s18  ;;  %v1446_v21 = vmov 0  }
  0xc0   : > { %557 = vrot.lane.b32.xlu0 %v549_v1, %s1443_s17  ;;  %1397 = vset.pattern.permute.xlu1 %v1446_v21 }
  0xc1   : > { %1396 = vset.pattern.permute.xlu0 %v1446_v21 }
  0xc3   : > { %366 = vrot.lane.b32.xlu1 %v365_v2, %s1432_s29 }
  0xc4   : > { %391 = vrot.lane.b32.xlu0 %v390_v3, %s1431_s28 }
  0xc7   : > { %229 = vrot.lane.b32.xlu1 %v228_v4, %s1434_s4 }
  0xc8   : > { %415 = vrot.lane.b32.xlu0 %v414_v5, %s1433_s30 }
  0xcb   : > { %249 = vrot.lane.b32.xlu1 %v248_v6, %s1436_s6 }
  0xcc   : > { %438 = vrot.lane.b32.xlu0 %v437_v7, %s1435_s5 }
  0xcf   : > { %272 = vrot.lane.b32.xlu1 %v271_v8, %s1437_s7 }
  0xd0   : > { %461 = vrot.lane.b32.xlu0 %v460_v9, %s1438_s8 }
  0xd3   : > { %295 = vrot.lane.b32.xlu1 %v294_v10, %s1439_s9 }
  0xd4   : > { %484 = vrot.lane.b32.xlu0 %v483_v11, %s1440_s10  ;;  %s1448_s10 = smov 127  }
  0xd7   : > { %318 = vrot.lane.b32.xlu1 %v317_v12, %s1441_s11  ;;  %v1248_v12 = vld [vmem:[%s1746_s1 + $0x18] sm:$0xf]  ;;  %s1344_s11 = smul.u32 48, %s1756_s12 }
  0xd8   : > { %532 = vrot.lane.b32.xlu0 %v531_v13, %s1443_s17  ;;  %v1256_v13 = vld [vmem:[%s1746_s1 + $0x20] sm:$0xff] }
  0xd9   : > { %s1720_s17 = scalar_lea.vmem %s1748_s3, %s1344_s11 }
  0xdb   : > { %509 = vrot.lane.b32.xlu1 %v508_v15, %s1442_s16  ;;  %v569_v15 = vld [vmem:[%s1746_s1] sm:$0xff] }
  0xdc   : > { %343 = vrot.lane.b32.xlu0 %v342_v14, %s1444_s18  ;;  %v1257_v14 = vld [vmem:[%s1746_s1 + $0x28] sm:$0xf] }
  0xdf   : > { %552 = vrot.lane.b32.xlu1 %v551_v17, %s1445_s21 }
  0xe0   : > { %526 = vrot.lane.b32.xlu0 %v524_v62, %s1445_s21 }
  0xe3   : > { %1141 = vperm.xlu1 %1397, %v1133_v20  }
  0xe4   : > { %1136 = vperm.xlu0 %1396, %v1132_v19  }
  0xf9   : > { %v361_v22 = vpop.permute.xlu1 %360 }
  0xfe   : > { %v1637_v23 = vpop.permute.xlu0 %335 }
  0xff   : > { %341 = vst.msk [vmem:[#allocation2 + $0x8] sm:$0xf] %vm340_vm5, %v1637_v23 }
 0x100   : > { %364 = vst.msk [vmem:[#allocation2 + $0x8] sm:$0xf] %vm363_vm6, %v361_v22 }
 0x101   : > { %v421_v25 = vpop.permute.xlu1 %420 }
 0x102   : > { %v1640_v24 = vpop.permute.xlu0 %396 }
 0x103   : > { %400 = vst.msk [vmem:[#allocation2 + $0x20] sm:$0xf] %vm340_vm5, %v1640_v24  ;;  %vm338_vm5 = vcmask 1044464  }
 0x104   : > { %423 = vst.msk [vmem:[#allocation2 + $0x20] sm:$0xf] %vm363_vm6, %v421_v25  ;;  %vm529_vm6 = vcmask 257136  }
 0x105   : > { %v386_v27 = vpop.permute.xlu1 %385 }
 0x106   : > { %v207_v26 = vpop.permute.xlu0 %206  ;;  %389 = vst.msk [vmem:[#allocation2 + $0x8] sm:$0xf] %vm388_vm8, %v386_v27 }
 0x107   : > { %210 = vst.msk [vmem:[#allocation2] sm:$0xf] %vm209_vm7, %v207_v26 }
 0x109   : > { %v444_v29 = vpop.permute.xlu1 %443 }
 0x10a   : > { %v255_v28 = vpop.permute.xlu0 %254  ;;  %446 = vst.msk [vmem:[#allocation2 + $0x20] sm:$0xf] %vm388_vm8, %v444_v29  ;;  %vm394_vm8 = vcmask 277636  }
 0x10b   : > { %257 = vst.msk [vmem:[#allocation2 + $0x18] sm:$0xf] %vm209_vm7, %v255_v28  ;;  %vm371_vm7 = vcmask 130052  }
 0x10d   : > { %v410_v31 = vpop.permute.xlu1 %409 }
 0x10e   : > { %v224_v30 = vpop.permute.xlu0 %223  ;;  %413 = vst.msk [vmem:[#allocation2 + $0x8] sm:$0xf] %vm412_vm10, %v410_v31 }
 0x10f   : > { %227 = vst.msk [vmem:[#allocation2] sm:$0xf] %vm226_vm9, %v224_v30 }
 0x111   : > { %v467_v33 = vpop.permute.xlu1 %466 }
 0x112   : > { %v278_v32 = vpop.permute.xlu0 %277  ;;  %469 = vst.msk [vmem:[#allocation2 + $0x20] sm:$0xf] %vm412_vm10, %v467_v33  ;;  %vm232_vm10 = vcmask 294036  }
 0x113   : > { %280 = vst.msk [vmem:[#allocation2 + $0x18] sm:$0xf] %vm226_vm9, %v278_v32  ;;  %vm418_vm9 = vcmask 425236  }
 0x115   : > { %v433_v35 = vpop.permute.xlu1 %432 }
 0x116   : > { %v244_v34 = vpop.permute.xlu0 %243  ;;  %436 = vst.msk [vmem:[#allocation2 + $0x8] sm:$0xf] %vm435_vm12, %v433_v35 }
 0x117   : > { %247 = vst.msk [vmem:[#allocation2] sm:$0xf] %vm246_vm11, %v244_v34 }
 0x119   : > { %v490_v37 = vpop.permute.xlu1 %489 }
 0x11a   : > { %v301_v36 = vpop.permute.xlu0 %300  ;;  %492 = vst.msk [vmem:[#allocation2 + $0x20] sm:$0xf] %vm435_vm12, %v490_v37  ;;  %vm252_vm12 = vcmask 441636  }
 0x11b   : > { %303 = vst.msk [vmem:[#allocation2 + $0x18] sm:$0xf] %vm246_vm11, %v301_v36  ;;  %vm441_vm11 = vcmask 572836  }
 0x11d   : > { %v456_v39 = vpop.permute.xlu1 %455 }
 0x11e   : > { %v267_v38 = vpop.permute.xlu0 %266  ;;  %459 = vst.msk [vmem:[#allocation2 + $0x8] sm:$0xf] %vm458_vm14, %v456_v39 }
 0x11f   : > { %270 = vst.msk [vmem:[#allocation2] sm:$0xf] %vm269_vm13, %v267_v38 }
 0x121   : > { %v515_v41 = vpop.permute.xlu1 %514 }
 0x122   : > { %v324_v40 = vpop.permute.xlu0 %323  ;;  %517 = vst.msk [vmem:[#allocation2 + $0x20] sm:$0xf] %vm458_vm14, %v515_v41  ;;  %vm275_vm14 = vcmask 589236  }
 0x123   : > { %326 = vst.msk [vmem:[#allocation2 + $0x18] sm:$0xf] %vm269_vm13, %v324_v40  ;;  %vm464_vm13 = vcmask 720436  }
 0x125   : > { %v479_v43 = vpop.permute.xlu1 %478 }
 0x126   : > { %v290_v42 = vpop.permute.xlu0 %289  ;;  %482 = vst.msk [vmem:[#allocation2 + $0x8] sm:$0xf] %vm481_vm0, %v479_v43 }
 0x127   : > { %293 = vst.msk [vmem:[#allocation2] sm:$0xf] %vm292_vm15, %v290_v42 }
 0x129   : > { %v540_v45 = vpop.permute.xlu1 %539 }
 0x12a   : > { %v349_v44 = vpop.permute.xlu0 %348  ;;  %542 = vst.msk [vmem:[#allocation2 + $0x20] sm:$0xf] %vm481_vm0, %v540_v45  ;;  %vm298_vm0 = vcmask 736836  }
 0x12b   : > { %351 = vst.msk [vmem:[#allocation2 + $0x18] sm:$0xf] %vm292_vm15, %v349_v44  ;;  %vm487_vm15 = vcmask 868036  }
 0x12d   : > { %v313_v47 = vpop.permute.xlu1 %312 }
 0x12e   : > { %v502_v46 = vpop.permute.xlu0 %501  ;;  %316 = vst.msk [vmem:[#allocation2] sm:$0xf] %vm315_vm3, %v313_v47 }
 0x12f   : > { %505 = vst.msk [vmem:[#allocation2 + $0x8] sm:$0xf] %vm504_vm1, %v502_v46 }
 0x130   : > { %507 = vst.msk [vmem:[#allocation2 + $0x10] sm:$0xf] %vm506_vm2, %v502_v46 }
 0x131   : > { %339 = vst.msk [vmem:[#allocation2] sm:$0xf] %vm338_vm5, %v1637_v23  ;;  %v374_v49 = vpop.permute.xlu1 %373 }
 0x132   : > { %v558_v48 = vpop.permute.xlu0 %557  ;;  %376 = vst.msk [vmem:[#allocation2 + $0x18] sm:$0xf] %vm315_vm3, %v374_v49  ;;  %vm346_vm3 = vcmask 1032036  }
 0x133   : > { %560 = vst.msk [vmem:[#allocation2 + $0x20] sm:$0xf] %vm504_vm1, %v558_v48  ;;  %vm537_vm1 = vcmask 113668  }
 0x134   : > { %561 = vst.msk [vmem:[#allocation2 + $0x28] sm:$0xf] %vm506_vm2, %v558_v48  ;;  %vm321_vm2 = vcmask 884436  }
 0x135   : > { %562 = vst.msk [vmem:[#allocation2 + $0x28] sm:$0xf] %vm529_vm6, %v1430_v18  ;;  %v367_v51 = vpop.permute.xlu1 %366 }
 0x136   : > { %399 = vst.msk [vmem:[#allocation2 + $0x18] sm:$0xf] %vm338_vm5, %v1640_v24  ;;  %v392_v50 = vpop.permute.xlu0 %391  ;;  %vm512_vm5 = vcmask 1015636  }
 0x137   : > { %372 = vst.msk [vmem:[#allocation2 + $0x8] sm:$0xf0] %vm371_vm7, %v367_v51  ;;  %vm369_vm7 = vcmask 1048564  }
 0x138   : > { %395 = vst.msk [vmem:[#allocation2 + $0x8] sm:$0xf0] %vm394_vm8, %v392_v50  ;;  %vm535_vm8 = vcmask 1048548  }
 0x139   : > { %v230_v53 = vpop.permute.xlu1 %229 }
 0x13a   : > { %v416_v52 = vpop.permute.xlu0 %415  ;;  %233 = vst.msk [vmem:[#allocation2] sm:$0xf0] %vm232_vm10, %v230_v53  ;;  %vm581_vm10 = vcmask 1043456   ;;  %v567_v2 = vld [vmem:[#allocation2 + $0x20] sm:$0xf] }
 0x13b   : > { %419 = vst.msk [vmem:[#allocation2 + $0x8] sm:$0xf0] %vm418_vm9, %v416_v52  ;;  %vm555_vm9 = vcmask 261236  }
 0x13c   : > { %v568_v9 = vld [vmem:[#allocation2 + $0x28] sm:$0xf] }
 0x13d   : > { %v250_v55 = vpop.permute.xlu1 %249  ;;  %v566_v6 = vld [vmem:[#allocation2 + $0x18] sm:$0xf] }
 0x13e   : > { %v439_v54 = vpop.permute.xlu0 %438  ;;  %253 = vst.msk [vmem:[#allocation2] sm:$0xf0] %vm252_vm12, %v250_v55 }
 0x13f   : > { %442 = vst.msk [vmem:[#allocation2 + $0x8] sm:$0xf0] %vm441_vm11, %v439_v54  ;;  %vm1447_vm11 = vmmov 1  }
 0x140   : > { %vm1648_vm12 = vmpackc.low %vm581_vm10, %vm1447_vm11 }
 0x141   : > { %v273_v57 = vpop.permute.xlu1 %272 }
 0x142   : > { %v462_v56 = vpop.permute.xlu0 %461  ;;  %276 = vst.msk [vmem:[#allocation2] sm:$0xf0] %vm275_vm14, %v273_v57  ;;  %vm1123_vm14 = vcmask 244736  }
 0x143   : > { %465 = vst.msk [vmem:[#allocation2 + $0x8] sm:$0xf0] %vm464_vm13, %v462_v56  ;;  %vm933_vm13 = vcmask 252928  }
 0x145   : > { %v296_v59 = vpop.permute.xlu1 %295 }
 0x146   : > { %v485_v58 = vpop.permute.xlu0 %484  ;;  %299 = vst.msk [vmem:[#allocation2] sm:$0xf0] %vm298_vm0, %v296_v59  ;;  %vm1156_vm0 = vcmask 257024  }
 0x147   : > { %488 = vst.msk [vmem:[#allocation2 + $0x8] sm:$0xf0] %vm487_vm15, %v485_v58  ;;  %vm1152_vm15 = vcmask 261120  }
 0x149   : > { %v319_v61 = vpop.permute.xlu1 %318 }
 0x14a   : > { %v533_v60 = vpop.permute.xlu0 %532  ;;  %322 = vst.msk [vmem:[#allocation2] sm:$0xf0] %vm321_vm2, %v319_v61 }
 0x14b   : > { %538 = vst.msk [vmem:[#allocation2 + $0x10] sm:$0xf0] %vm537_vm1, %v533_v60 }
 0x14d   : > { %v510_v63 = vpop.permute.xlu1 %509 }
 0x14e   : > { %v344_v62 = vpop.permute.xlu0 %343  ;;  %513 = vst.msk [vmem:[#allocation2 + $0x8] sm:$0xf0] %vm512_vm5, %v510_v63 }
 0x14f   : > { %347 = vst.msk [vmem:[#allocation2] sm:$0xf0] %vm346_vm3, %v344_v62 }
 0x150   : > { %370 = vst.msk [vmem:[#allocation2] sm:$0xf0] %vm369_vm7, %v367_v51 }
 0x151   : > { %536 = vst.msk [vmem:[#allocation2 + $0x8] sm:$0xf0] %vm535_vm8, %v533_v60  ;;  %v553_v1 = vpop.permute.xlu1 %552 }
 0x152   : > { %v527_v0 = vpop.permute.xlu0 %526  ;;  %556 = vst.msk [vmem:[#allocation2 + $0x10] sm:$0xf0] %vm555_vm9, %v553_v1 }
 0x153   : > { %530 = vst.msk [vmem:[#allocation2 + $0x10] sm:$0xf] %vm529_vm6, %v527_v0  ;;  %vm1112_vm6 = vcmask 1031168  }
 0x157   : > { %v563_v5 = vld [vmem:[#allocation2] sm:$0xff] }
 0x158   : > { %v564_v4 = vld [vmem:[#allocation2 + $0x8] sm:$0xff]  ;;  %v1311_v8 = vpack.c.bf16 %v566_v6, %v563_v5 }
 0x159   : > { %v1308_v7 = vpack.c.bf16 %v567_v2, %v564_v4 }
 0x15a   : > { %v565_v10 = vld [vmem:[#allocation2 + $0x10] sm:$0xff] }
 0x15b   : > { %1310 = vmatprep.subr.msk.bf16.mxu0 %vm1648_vm12, %v1308_v7  ;;  %v1314_v11 = vpack.c.bf16 %v568_v9, %v565_v10 }
 0x15c   : > { %1313 = vmatpush1.bf16.msk.msra.mxu0 %vm1648_vm12, %v1311_v8 }
 0x15d   : > { %1316 = vmatprep.subr.msk.bf16.mxu1 %vm1648_vm12, %v1314_v11  ;;  %1328 = vmatprep.subr.msk.bf16.mxu0 %vm1648_vm12, %v1314_v11 }
 0x15e   : > { %1319 = vmatpush3.bf16.msk.msra.mxu1 %vm1648_vm12, %v1314_v11 }
 0x15f   : > { %1251 = vmatmul.mubr.msk.f32.vlgmr.msra.gmra.mrb[0].mxu0 %vm574_vm4, %v1627_v16  ;;  %1322 = vmatprep.subr.msk.bf16.mxu1 %vm1648_vm12, %v1308_v7  ;;  %v570_v16 = vld [vmem:[%s1746_s1 + $0x8] sm:$0xf] }
 0x160   : > { %1331 = vmatpush3.bf16.msk.msra.mxu0 %vm1648_vm12, %v1314_v11  ;;  %661 = vmatprep.mubr.f32.mxu0 %v1430_v18 }
 0x161   : > { %1334 = vmatprep.subr.msk.bf16.mxu0 %vm1648_vm12, %v1308_v7  ;;  %1292 = vmatmul.mubr.msk.f32.vlgmr.msra.gmra.mrb[0].mxu1 %vm574_vm4, %v1248_v12 }
 0x162   : > { %1325 = vmatpush1.bf16.msk.msra.mxu1 %vm1648_vm12, %v1311_v8  ;;  %816 = vmatprep.mubr.f32.mxu1 %v1430_v18  ;;  %v1142_v36 = vpop.permute.xlu1 %1141 }
 0x163   : > { %1252 = vmatmul.mubr.msk.f32.gmra.mrb[2].mxu0 %vm574_vm4, %v1248_v12  ;;  %1340 = vmatprep.subr.msk.bf16.mxu1 %vm1648_vm12, %v1314_v11  ;;  %v1137_v35 = vpop.permute.xlu0 %1136 }
 0x164   : > { %1298 = vmatprep.mubr.msk.f32.mxu0 %vm574_vm4, %v1256_v13 }
 0x165   : > { %1260 = vmatmul.mubr.msk.f32.vlgmr.msra.gmra.mrb[2].mxu1 %vm574_vm4, %v1256_v13 }
 0x166   : > { %1343 = vmatpush3.bf16.msk.msra.mxu1 %vm1648_vm12, %v1314_v11  ;;  %822 = vmatprep.mubr.f32.mxu1 %v1430_v18 }
 0x167   : > { %1299 = vmatmul.mubr.msk.f32.vlgmr.msra.gmra.mrb[4].mxu0 %vm574_vm4, %v1257_v14 }
 0x168   : > { %1337 = vmatpush1.bf16.msk.msra.mxu0 %vm1648_vm12, %v1311_v8  ;;  %1006 = vmatprep.mubr.f32.mxu0 %v1430_v18 }
 0x169   : > { %1261 = vmatmul.mubr.msk.f32.gmra.mrb[4].mxu1 %vm574_vm4, %v1257_v14 }
 0x16a   : > { %1305 = vmatprep.mubr.msk.f32.mxu1 %vm574_vm4, %v569_v15 }
 0x16b   : > { %1267 = vmatmul.mubr.msk.f32.vlgmr.msra.gmra.mrb[6].mxu0 %vm574_vm4, %v569_v15 }
 0x16c   : > { %1012 = vmatprep.mubr.f32.mxu0 %v1430_v18 }
 0x16d   : > { %1306 = vmatmul.mubr.msk.f32.vlgmr.msra.gmra.mrb[6].mxu1 %vm574_vm4, %v570_v16 }
 0x16f   : > { %1268 = vmatmul.mubr.msk.f32.gmra.mrb[8].mxu0 %vm574_vm4, %v570_v16  ;;  %vm922_vm4 = vcmask 1039360  }
 0x232   : > { %v657_v17 = vpop.f32.mrb[0].mxu0 }
 0x233   : > { %v659_v19 = vpop.f32.mrb[1].mxu0 }
 0x234   : > { %v1293_v20 = vpop.f32.mrb[0].mxu1 }
 0x235   : > { %920 = vrot.lane.b32.xlu0 %v1293_v20, %s1448_s10  ;;  %v734_v21 = vpop.f32.mrb[1].mxu1 }
 0x236   : > { %v663_v22 = vpop.f32.mrb[2].mxu0  ;;  %914 = vrot.lane.b32.xlu1 %v734_v21, %s1448_s10 }
 0x237   : > { %v665_v23 = vpop.f32.mrb[3].mxu0 }
 0x238   : > { %v818_v24 = vpop.f32.mrb[2].mxu1 }
 0x239   : > { %912 = vrot.lane.b32.xlu0 %v659_v19, %s1448_s10  ;;  %v820_v25 = vpop.f32.mrb[3].mxu1 }
 0x23a   : > { %v1300_v26 = vpop.f32.mrb[4].mxu0  ;;  %910 = vrot.lane.b32.xlu1 %v657_v17, %s1448_s10 }
 0x23b   : > { %v895_v27 = vpop.f32.mrb[5].mxu0 }
 0x23c   : > { %v824_v18 = vpop.f32.mrb[4].mxu1 }
 0x23d   : > { %1102 = vrot.lane.b32.xlu0 %v820_v25, %s1432_s29  ;;  %v826_v28 = vpop.f32.mrb[5].mxu1 }
 0x23e   : > { %v1008_v29 = vpop.f32.mrb[6].mxu0  ;;  %1100 = vrot.lane.b32.xlu1 %v818_v24, %s1432_s29 }
 0x23f   : > { %v1010_v30 = vpop.f32.mrb[7].mxu0 }
 0x240   : > { %v1307_v31 = vpop.f32.mrb[6].mxu1 }
 0x241   : > { %916 = vrot.lane.b32.xlu0 %v663_v22, %s1448_s10  ;;  %v1085_v32 = vpop.f32.mrb[7].mxu1 }
 0x242   : > { %v1014_v33 = vpop.f32.mrb[8].mxu0  ;;  %918 = vrot.lane.b32.xlu1 %v665_v23, %s1448_s10 }
 0x243   : > { %v1016_v34 = vpop.f32.mrb[9].mxu0 }
 0x245   : > { %1106 = vrot.lane.b32.xlu0 %v824_v18, %s1432_s29 }
 0x246   : > { %1104 = vrot.lane.b32.xlu1 %v895_v27, %s1432_s29 }
 0x249   : > { %1110 = vrot.lane.b32.xlu0 %v1300_v26, %s1432_s29 }
 0x24a   : > { %1108 = vrot.lane.b32.xlu1 %v826_v28, %s1432_s29 }
 0x2a7   : > { %v921_v37 = vpop.permute.xlu0 %920 }
 0x2a8   : > { %v915_v38 = vpop.permute.xlu1 %914  ;;  %v935_v53 = vsel %vm933_vm13, %v921_v37, 0.0 }
 0x2a9   : > { %v934_v50 = vsel %vm933_vm13, %v915_v38, 0.0  ;;  %v1091_v63 = vadd.f32 %v1307_v31, %v935_v53 }
 0x2aa   : > { %v1086_v54 = vadd.f32 %v1085_v32, %v934_v50 }
 0x2ab   : > { %v913_v39 = vpop.permute.xlu0 %912 }
 0x2ac   : > { %v911_v40 = vpop.permute.xlu1 %910  ;;  %v924_v51 = vsel %vm922_vm4, %v913_v39, %v915_v38 }
 0x2ad   : > { %v923_v41 = vsel %vm922_vm4, %v911_v40, %v913_v39  ;;  %v1011_v55 = vadd.f32 %v1010_v30, %v924_v51 }
 0x2ae   : > { %v1009_v43 = vadd.f32 %v1008_v29, %v923_v41 }
 0x2af   : > { %v1103_v42 = vpop.permute.xlu0 %1102 }
 0x2b0   : > { %v1101_v44 = vpop.permute.xlu1 %1100 }
 0x2b1   : > { %v1113_v45 = vsel %vm1112_vm6, %v1101_v44, %v1103_v42 }
 0x2b2   : > { %v1126_v46 = vadd.f32 %v1113_v45, %v1009_v43 }
 0x2b3   : > { %v917_v47 = vpop.permute.xlu0 %916 }
 0x2b4   : > { %v1144_v48 = vadd.f32 %v1137_v35, %v1126_v46  ;;  %v919_v49 = vpop.permute.xlu1 %918 }
 0x2b5   : > { %v925_v56 = vsel %vm922_vm4, %v917_v47, %v919_v49  ;;  %v926_v58 = vsel %vm922_vm4, %v919_v49, %v921_v37 }
 0x2b6   : > { %1150 = vst [vmem:[%s1720_s17] sm:$0xff] %v1144_v48  ;;  %v1015_v0 = vadd.f32 %v1014_v33, %v925_v56  ;;  %v1017_v2 = vadd.f32 %v1016_v34, %v926_v58 }
 0x2b7   : > { %v1107_v52 = vpop.permute.xlu0 %1106 }
 0x2b8   : > { %v1105_v57 = vpop.permute.xlu1 %1104 }
 0x2b9   : > { %v1114_v59 = vsel %vm1112_vm6, %v1103_v42, %v1105_v57  ;;  %v1124_v60 = vsel %vm1123_vm14, %v1105_v57, 0.0 }
 0x2ba   : > { %v1127_v61 = vadd.f32 %v1114_v59, %v1011_v55  ;;  %v1128_v62 = vadd.f32 %v1124_v60, %v1086_v54 }
 0x2bb   : > { %v1111_v1 = vpop.permute.xlu0 %1110 }
 0x2bc   : > { %v1145_v3 = vadd.f32 %v1137_v35, %v1127_v61  ;;  %v1125_v4 = vsel %vm1123_vm14, %v1111_v1, 0.0  ;;  %v1146_v5 = vadd.f32 %v1137_v35, %v1128_v62  ;;  %v1109_v6 = vpop.permute.xlu1 %1108 }
 0x2bd   : > { %v1131_v7 = vadd.f32 %v1125_v4, %v1091_v63  ;;  %v1115_v8 = vsel %vm1112_vm6, %v1107_v52, %v1109_v6  ;;  %v1116_v9 = vsel %vm1112_vm6, %v1109_v6, %v1111_v1 }
 0x2be   : > { %1151 = vst [vmem:[%s1720_s17 + $0x8] sm:$0xff] %v1145_v3  ;;  %1153 = vst.msk [vmem:[%s1720_s17 + $0x10] sm:$0xff] %vm1152_vm15, %v1146_v5  ;;  %v1129_v10 = vadd.f32 %v1115_v8, %v1015_v0  ;;  %v1130_v11 = vadd.f32 %v1116_v9, %v1017_v2 }
 0x2bf   : > { %v1149_v12 = vadd.f32 %v1142_v36, %v1131_v7 }
 0x2c0   : > { %v1147_v13 = vadd.f32 %v1142_v36, %v1129_v10  ;;  %v1148_v14 = vadd.f32 %v1142_v36, %v1130_v11 }
 0x2c1   : > { %1157 = vst.msk [vmem:[%s1720_s17 + $0x28] sm:$0xf] %vm1156_vm0, %v1149_v12 }
 0x2c2   : > { %1154 = vst [vmem:[%s1720_s17 + $0x18] sm:$0xf] %v1147_v13  ;;  %1155 = vst [vmem:[%s1720_s17 + $0x20] sm:$0xf] %v1148_v14 }
 0x2c3 PF: > { %s13_s14 = sadd.s32 1, %s1420_s14   ;;  %s1751_s12 = smov %s1416_s13 }
 0x2c4   : > { %p10_p5 = scmp.ge.s32.totalorder %s13_s14, 4   ;;  %s1752_s13 = smov %s1754_s15 }
 0x2c6   :  { %12 = sbr.rel (!%p10_p5) target bundleno = 2 (0x2), region = 64 }

</bundles_post_ra>
